<compile_context>
chip_gen: v5e
topology: v5e:2x2
jax: 0.10.0
libtpu: 0.0.40
codegen_flags: <defaults>
</compile_context>

<pallas_src>
import math
import jax
import jax.numpy as jnp
from jax import lax
from jax.experimental import pallas as pl
from jax.experimental.pallas import tpu as pltpu

# ---- small synthetic config (consistent with Llama2Config fields) ----------
B = 2                 # batch
S = 8                 # seq len
H = 32                # hidden_size
N_HEADS = 4           # num_attention_heads
N_KV = 2              # num_key_value_heads (GQA, exercises repeat_kv)
HD = H // N_HEADS     # head_dim = 8
N_REP = N_HEADS // N_KV
INTER = 64            # intermediate_size
EPS = 1e-6            # rms_norm_eps
ROPE_BASE = 10000.0

QW = N_HEADS * HD     # 32
KW = N_KV * HD        # 16
HALF = QW + 2 * KW    # 64  : [q | k | v]
QKV_W = 2 * HALF      # 128 : [q | k | v | rot_q | rot_k | pad]


def decoder_layer_kernel(x_ref, mask_ref, cs_ref, ln_ref,
                         wqkv_ref, wo_ref, wgu_ref, wd_ref, out_ref):
    x = x_ref[...]                                     # (S, H), one batch element

    # ---- input_layernorm (RMSNorm, f32) ----
    ln1 = ln_ref[0:1, :]
    xn = ln1 * (x * lax.rsqrt(jnp.mean(x * x, axis=-1, keepdims=True) + EPS))

    # ---- fused QKV (+ rotate_half'd q/k columns): ONE 128-lane-dense matmul ----
    qkv = jnp.dot(xn, wqkv_ref[...], preferred_element_type=jnp.float32)   # (S, 128)

    # ---- RoPE: one full-width VPU FMA, single aligned half-tile split ----
    # cs = [cos_q|cos_k|ones | sin_q|sin_k|zeros]; v lanes pass through (ones/zeros).
    roped = (qkv[:, :HALF] * cs_ref[:, :HALF]
             + qkv[:, HALF:] * cs_ref[:, HALF:])        # (S, 64) = [q_emb|k_emb|v]

    # ---- head-batched attention (GQA via slice reuse = repeat_kv) ----
    q3 = jnp.stack([roped[:, h * HD:(h + 1) * HD]
                    for h in range(N_HEADS)], axis=0)                       # (NH, S, HD)
    k3 = jnp.stack([roped[:, QW + (h // N_REP) * HD: QW + (h // N_REP + 1) * HD]
                    for h in range(N_HEADS)], axis=0)                       # (NH, S, HD)
    v3 = jnp.stack([roped[:, QW + KW + (h // N_REP) * HD: QW + KW + (h // N_REP + 1) * HD]
                    for h in range(N_HEADS)], axis=0)                       # (NH, S, HD)

    scale = 1.0 / math.sqrt(HD)
    scores = jnp.einsum('hqd,hkd->hqk', q3, k3,
                        preferred_element_type=jnp.float32) * scale
    scores = scores + mask_ref[...][None]              # (NH,S,S) + (1,S,S) broadcast
    scores = scores - jnp.max(scores, axis=-1, keepdims=True)
    p = jnp.exp(scores)
    # exact division to stay within the f32 reference tolerance;
    # p * pl.reciprocal(sum, approx=True) routes this to the EUP if looser is ok.
    probs = p / jnp.sum(p, axis=-1, keepdims=True)
    attn3 = jnp.einsum('hqk,hkd->hqd', probs, v3,
                       preferred_element_type=jnp.float32)                  # (NH, S, HD)

    # lane-concat heads -> (S, NH*HD) and o_proj as ONE matmul
    attn2 = jnp.concatenate([attn3[h] for h in range(N_HEADS)], axis=-1)    # (S, 32)
    attn_o = jnp.dot(attn2, wo_ref[...], preferred_element_type=jnp.float32)
    h1 = x + attn_o                                    # first residual

    # ---- post_attention_layernorm + SwiGLU MLP (gate|up fused, 128-lane output) ----
    ln2 = ln_ref[1:2, :]
    h1n = ln2 * (h1 * lax.rsqrt(jnp.mean(h1 * h1, axis=-1, keepdims=True) + EPS))
    gu = jnp.dot(h1n, wgu_ref[...], preferred_element_type=jnp.float32)     # (S, 128)
    gate = gu[:, :INTER]
    up = gu[:, INTER:]
    sig = 1.0 / (1.0 + jnp.exp(-gate))                 # SiLU (exact; lax.logistic drop-in)
    inter = gate * sig * up
    down = jnp.dot(inter, wd_ref[...], preferred_element_type=jnp.float32)

    out_ref[...] = h1 + down                           # second residual


def llama_decoder_layer(x, mask, cos, sin, ln1, ln2, Wq, Wk, Wv, Wo, Wg, Wu, Wd):
    """x: (B,S,H); mask: (B,1,S,S) additive; weights in nn.Linear (out,in) layout."""
    # ---- host-side weight fusion / input packing (exact, layout-only) ----
    def rot_cols(wt, n_heads):
        # wt @ block_diag(rotate_half): a signed column permutation (exact).
        w = wt.reshape(H, n_heads, HD)
        return jnp.concatenate([-w[..., HD // 2:], w[..., :HD // 2]],
                               axis=-1).reshape(H, n_heads * HD)

    WqT, WkT, WvT = Wq.T, Wk.T, Wv.T
    wqkv = jnp.concatenate(
        [WqT, WkT, WvT,
         rot_cols(WqT, N_HEADS), rot_cols(WkT, N_KV),
         jnp.zeros((H, KW), jnp.float32)], axis=1)                    # (H, 128)
    wgu = jnp.concatenate([Wg.T, Wu.T], axis=1)                        # (H, 128)

    # cos/sin packed to match the qkv lane order; ones/zeros let v pass through RoPE.
    cs = jnp.concatenate(
        [jnp.tile(cos, (1, N_HEADS)), jnp.tile(cos, (1, N_KV)),
         jnp.ones((S, KW), jnp.float32),
         jnp.tile(sin, (1, N_HEADS)), jnp.tile(sin, (1, N_KV)),
         jnp.zeros((S, KW), jnp.float32)], axis=1)                     # (S, 128)

    ln = jnp.stack([ln1, ln2], axis=0)                                 # (2, H)
    mask_b = mask.reshape(B, S, S)                                     # per-batch (S,S)

    out = pl.pallas_call(
        decoder_layer_kernel,
        out_shape=jax.ShapeDtypeStruct((B, S, H), jnp.float32),
        grid=(B,),
        in_specs=[
            pl.BlockSpec((None, S, H), lambda b: (b, 0, 0)),           # x, per batch
            pl.BlockSpec((None, S, S), lambda b: (b, 0, 0)),           # mask, per batch
            pl.BlockSpec((S, QKV_W), lambda b: (0, 0)),                # cos/sin slab
            pl.BlockSpec((2, H), lambda b: (0, 0)),                    # rmsnorm weights
            pl.BlockSpec((H, QKV_W), lambda b: (0, 0)),                # fused qkv + rot
            pl.BlockSpec((QW, H), lambda b: (0, 0)),                   # o_proj
            pl.BlockSpec((H, 2 * INTER), lambda b: (0, 0)),            # gate | up
            pl.BlockSpec((INTER, H), lambda b: (0, 0)),                # down
        ],
        out_specs=pl.BlockSpec((None, S, H), lambda b: (b, 0, 0)),
        compiler_params=pltpu.CompilerParams(
            dimension_semantics=("parallel",)),                        # 2nd TC on v7x
    )(x, mask_b, cs, ln, wqkv, Wo.T, wgu, Wd.T)
    return out


# ---------------- pure-JAX reference (mirrors the PyTorch forward) -----------
def reference(x, mask, cos, sin, Wq, Wk, Wv, Wo, Wg, Wu, Wd, ln1, ln2):
    def rmsnorm(h, w):
        var = jnp.mean(h * h, axis=-1, keepdims=True)
        return w * (h * lax.rsqrt(var + EPS))

    def rotate_half(t):
        t1 = t[..., :HD // 2]
        t2 = t[..., HD // 2:]
        return jnp.concatenate([-t2, t1], axis=-1)

    residual = x
    hn = rmsnorm(x, ln1)
    q = hn @ Wq.T
    k = hn @ Wk.T
    v = hn @ Wv.T
    q = q.reshape(B, S, N_HEADS, HD).transpose(0, 2, 1, 3)
    k = k.reshape(B, S, N_KV, HD).transpose(0, 2, 1, 3)
    v = v.reshape(B, S, N_KV, HD).transpose(0, 2, 1, 3)
    c = cos[None, None]
    s = sin[None, None]
    q = q * c + rotate_half(q) * s
    k = k * c + rotate_half(k) * s
    k = jnp.repeat(k, N_REP, axis=1)      # repeat_kv
    v = jnp.repeat(v, N_REP, axis=1)
    scores = jnp.einsum('bhqd,bhkd->bhqk', q, k) / math.sqrt(HD) + mask
    probs = jax.nn.softmax(scores, axis=-1)
    attn = jnp.einsum('bhqk,bhkd->bhqd', probs, v)
    attn = attn.transpose(0, 2, 1, 3).reshape(B, S, H)
    attn = attn @ Wo.T
    h1 = residual + attn
    h1n = rmsnorm(h1, ln2)
    mlp = (jax.nn.silu(h1n @ Wg.T) * (h1n @ Wu.T)) @ Wd.T
    return h1 + mlp


if __name__ == "__main__":
    key = jax.random.PRNGKey(0)
    keys = jax.random.split(key, 8)

    def init_w(k, out_f, in_f):
        # nn.Linear weight layout: (out_features, in_features), bias=False
        return jax.random.normal(k, (out_f, in_f), jnp.float32) * 0.05

    Wq = init_w(keys[0], N_HEADS * HD, H)
    Wk = init_w(keys[1], N_KV * HD, H)
    Wv = init_w(keys[2], N_KV * HD, H)
    Wo = init_w(keys[3], H, N_HEADS * HD)
    Wg = init_w(keys[4], INTER, H)
    Wu = init_w(keys[5], INTER, H)
    Wd = init_w(keys[6], H, INTER)
    ln1 = jnp.ones((H,), jnp.float32)
    ln2 = jnp.ones((H,), jnp.float32)

    x = jax.random.normal(keys[7], (B, S, H), jnp.float32)

    # Rotary embedding cache (LlamaRotaryEmbedding, no scaling), gathered by
    # position_ids = arange(S) in plain-JAX glue.
    inv_freq = 1.0 / (ROPE_BASE ** (jnp.arange(0, HD, 2, dtype=jnp.float32) / HD))
    t = jnp.arange(S, dtype=jnp.float32)
    freqs = jnp.outer(t, inv_freq)
    emb = jnp.concatenate([freqs, freqs], axis=-1)        # (S, HD)
    position_ids = jnp.arange(S)
    cos = jnp.cos(emb)[position_ids]
    sin = jnp.sin(emb)[position_ids]

    # Additive causal attention mask (batch, 1, q_len, kv_len)
    causal = jnp.where(jnp.arange(S)[:, None] >= jnp.arange(S)[None, :],
                       0.0, -1e9).astype(jnp.float32)
    mask = jnp.broadcast_to(causal, (B, 1, S, S))

    out = llama_decoder_layer(x, mask, cos, sin, ln1, ln2,
                              Wq, Wk, Wv, Wo, Wg, Wu, Wd)
    out = jax.block_until_ready(out)

    ref = reference(x, mask, cos, sin, Wq, Wk, Wv, Wo, Wg, Wu, Wd, ln1, ln2)
    assert out.shape == (B, S, H)
    assert jnp.allclose(out, ref, atol=2e-4, rtol=2e-4), \
        f"max err {jnp.max(jnp.abs(out - ref))}"

    print("KERNEL_OK")
</pallas_src>

<mosaic_0001>
module attributes {stable_mosaic.version = 11 : i64} {
  func.func @decoder_layer_kernel(%arg0: i32, %arg1: memref<1x8x32xf32, #tpu.memory_space<vmem>>, %arg2: memref<1x8x8xf32, #tpu.memory_space<vmem>>, %arg3: memref<8x128xf32, #tpu.memory_space<vmem>>, %arg4: memref<2x32xf32, #tpu.memory_space<vmem>>, %arg5: memref<32x128xf32, #tpu.memory_space<vmem>>, %arg6: memref<32x32xf32, #tpu.memory_space<vmem>>, %arg7: memref<32x128xf32, #tpu.memory_space<vmem>>, %arg8: memref<64x32xf32, #tpu.memory_space<vmem>>, %arg9: memref<1x8x32xf32, #tpu.memory_space<vmem>>) attributes {dimension_semantics = [#tpu.dimension_semantics<parallel>], iteration_bounds = array<i64: 2>, scalar_prefetch = 0 : i64, scratch_operands = 0 : i64, tpu.core_type = #tpu.core_type<tc>, window_params = [{transform_indices = @transform_0, window_bounds = array<i64: 1, 8, 32>}, {transform_indices = @transform_1, window_bounds = array<i64: 1, 8, 8>}, {pipeline_mode = #tpu.pipeline_mode<synchronous>, transform_indices = @transform_2, window_bounds = array<i64: 8, 128>}, {pipeline_mode = #tpu.pipeline_mode<synchronous>, transform_indices = @transform_3, window_bounds = array<i64: 2, 32>}, {pipeline_mode = #tpu.pipeline_mode<synchronous>, transform_indices = @transform_4, window_bounds = array<i64: 32, 128>}, {pipeline_mode = #tpu.pipeline_mode<synchronous>, transform_indices = @transform_5, window_bounds = array<i64: 32, 32>}, {pipeline_mode = #tpu.pipeline_mode<synchronous>, transform_indices = @transform_6, window_bounds = array<i64: 32, 128>}, {pipeline_mode = #tpu.pipeline_mode<synchronous>, transform_indices = @transform_7, window_bounds = array<i64: 64, 32>}, {transform_indices = @transform_8, window_bounds = array<i64: 1, 8, 32>}]} {
    %c0 = arith.constant 0 : index
    %c0_0 = arith.constant 0 : index
    %c0_1 = arith.constant 0 : index
    %0 = vector.load %arg1[%c0, %c0_0, %c0_1] : memref<1x8x32xf32, #tpu.memory_space<vmem>>, vector<1x8x32xf32>
    %1 = vector.shape_cast %0 : vector<1x8x32xf32> to vector<8x32xf32>
    %c0_2 = arith.constant 0 : index
    %c0_3 = arith.constant 0 : index
    %2 = vector.load %arg4[%c0_2, %c0_3] : memref<2x32xf32, #tpu.memory_space<vmem>>, vector<1x32xf32>
    %3 = arith.mulf %1, %1 : vector<8x32xf32>
    %cst = arith.constant dense<0.000000e+00> : vector<8xf32>
    %4 = vector.multi_reduction <add>, %3, %cst [1] : vector<8x32xf32> to vector<8xf32>
    %5 = vector.shape_cast %4 : vector<8xf32> to vector<8x1xf32>
    %cst_4 = arith.constant 3.200000e+01 : f32
    %6 = vector.broadcast %cst_4 : f32 to vector<8x1xf32>
    %7 = arith.divf %5, %6 : vector<8x1xf32>
    %cst_5 = arith.constant 9.99999997E-7 : f32
    %8 = vector.broadcast %cst_5 : f32 to vector<8x1xf32>
    %9 = arith.addf %7, %8 : vector<8x1xf32>
    %10 = math.rsqrt %9 : vector<8x1xf32>
    %11 = vector.broadcast %10 : vector<8x1xf32> to vector<8x32xf32>
    %12 = arith.mulf %1, %11 : vector<8x32xf32>
    %13 = vector.broadcast %2 : vector<1x32xf32> to vector<8x32xf32>
    %14 = arith.mulf %13, %12 : vector<8x32xf32>
    %c0_6 = arith.constant 0 : index
    %c0_7 = arith.constant 0 : index
    %15 = vector.load %arg5[%c0_6, %c0_7] : memref<32x128xf32, #tpu.memory_space<vmem>>, vector<32x128xf32>
    %cst_8 = arith.constant dense<0.000000e+00> : vector<8x128xf32>
    %16 = tpu.matmul %14, %15, %cst_8 {dimension_numbers = #tpu.dot_dimension_numbers<[1], [0], [0], [1], [0, 0, 1, 1], [], []>} : vector<8x32xf32>, vector<32x128xf32>, vector<8x128xf32> -> vector<8x128xf32>
    %17 = vector.extract_strided_slice %16 {offsets = [0, 0], sizes = [8, 64], strides = [1, 1]} : vector<8x128xf32> to vector<8x64xf32>
    %c0_9 = arith.constant 0 : index
    %c0_10 = arith.constant 0 : index
    %18 = vector.load %arg3[%c0_9, %c0_10] : memref<8x128xf32, #tpu.memory_space<vmem>>, vector<8x64xf32>
    %19 = arith.mulf %17, %18 : vector<8x64xf32>
    %20 = vector.extract_strided_slice %16 {offsets = [0, 64], sizes = [8, 64], strides = [1, 1]} : vector<8x128xf32> to vector<8x64xf32>
    %c0_11 = arith.constant 0 : index
    %c64 = arith.constant 64 : index
    %21 = vector.load %arg3[%c0_11, %c64] : memref<8x128xf32, #tpu.memory_space<vmem>>, vector<8x64xf32>
    %22 = arith.mulf %20, %21 : vector<8x64xf32>
    %23 = arith.addf %19, %22 : vector<8x64xf32>
    %24 = vector.extract_strided_slice %23 {offsets = [0, 0], sizes = [8, 8], strides = [1, 1]} : vector<8x64xf32> to vector<8x8xf32>
    %25 = vector.extract_strided_slice %23 {offsets = [0, 8], sizes = [8, 8], strides = [1, 1]} : vector<8x64xf32> to vector<8x8xf32>
    %26 = vector.extract_strided_slice %23 {offsets = [0, 16], sizes = [8, 8], strides = [1, 1]} : vector<8x64xf32> to vector<8x8xf32>
    %27 = vector.extract_strided_slice %23 {offsets = [0, 24], sizes = [8, 8], strides = [1, 1]} : vector<8x64xf32> to vector<8x8xf32>
    %28 = vector.shape_cast %24 : vector<8x8xf32> to vector<1x8x8xf32>
    %29 = vector.shape_cast %25 : vector<8x8xf32> to vector<1x8x8xf32>
    %30 = vector.shape_cast %26 : vector<8x8xf32> to vector<1x8x8xf32>
    %31 = vector.shape_cast %27 : vector<8x8xf32> to vector<1x8x8xf32>
    %32 = tpu.concatenate %28, %29, %30, %31 in 0 : vector<1x8x8xf32>, vector<1x8x8xf32>, vector<1x8x8xf32>, vector<1x8x8xf32> -> vector<4x8x8xf32>
    %33 = vector.extract_strided_slice %23 {offsets = [0, 32], sizes = [8, 8], strides = [1, 1]} : vector<8x64xf32> to vector<8x8xf32>
    %34 = vector.extract_strided_slice %23 {offsets = [0, 32], sizes = [8, 8], strides = [1, 1]} : vector<8x64xf32> to vector<8x8xf32>
    %35 = vector.extract_strided_slice %23 {offsets = [0, 40], sizes = [8, 8], strides = [1, 1]} : vector<8x64xf32> to vector<8x8xf32>
    %36 = vector.extract_strided_slice %23 {offsets = [0, 40], sizes = [8, 8], strides = [1, 1]} : vector<8x64xf32> to vector<8x8xf32>
    %37 = vector.shape_cast %33 : vector<8x8xf32> to vector<1x8x8xf32>
    %38 = vector.shape_cast %34 : vector<8x8xf32> to vector<1x8x8xf32>
    %39 = vector.shape_cast %35 : vector<8x8xf32> to vector<1x8x8xf32>
    %40 = vector.shape_cast %36 : vector<8x8xf32> to vector<1x8x8xf32>
    %41 = tpu.concatenate %37, %38, %39, %40 in 0 : vector<1x8x8xf32>, vector<1x8x8xf32>, vector<1x8x8xf32>, vector<1x8x8xf32> -> vector<4x8x8xf32>
    %42 = vector.extract_strided_slice %23 {offsets = [0, 48], sizes = [8, 8], strides = [1, 1]} : vector<8x64xf32> to vector<8x8xf32>
    %43 = vector.extract_strided_slice %23 {offsets = [0, 48], sizes = [8, 8], strides = [1, 1]} : vector<8x64xf32> to vector<8x8xf32>
    %44 = vector.extract_strided_slice %23 {offsets = [0, 56], sizes = [8, 8], strides = [1, 1]} : vector<8x64xf32> to vector<8x8xf32>
    %45 = vector.extract_strided_slice %23 {offsets = [0, 56], sizes = [8, 8], strides = [1, 1]} : vector<8x64xf32> to vector<8x8xf32>
    %46 = vector.shape_cast %42 : vector<8x8xf32> to vector<1x8x8xf32>
    %47 = vector.shape_cast %43 : vector<8x8xf32> to vector<1x8x8xf32>
    %48 = vector.shape_cast %44 : vector<8x8xf32> to vector<1x8x8xf32>
    %49 = vector.shape_cast %45 : vector<8x8xf32> to vector<1x8x8xf32>
    %50 = tpu.concatenate %46, %47, %48, %49 in 0 : vector<1x8x8xf32>, vector<1x8x8xf32>, vector<1x8x8xf32>, vector<1x8x8xf32> -> vector<4x8x8xf32>
    "tpu.trace_start"() <{level = 10 : i32, message = "hqd,hkd->hqk"}> : () -> ()
    %cst_12 = arith.constant dense<0.000000e+00> : vector<4x8x8xf32>
    %51 = tpu.matmul %32, %41, %cst_12 {dimension_numbers = #tpu.dot_dimension_numbers<[2], [2], [1], [1], [0, 0, 0, 1, 1, 1], [0], [0]>} : vector<4x8x8xf32>, vector<4x8x8xf32>, vector<4x8x8xf32> -> vector<4x8x8xf32>
    "tpu.trace_stop"() : () -> ()
    %cst_13 = arith.constant 0.353553385 : f32
    %52 = vector.broadcast %cst_13 : f32 to vector<4x8x8xf32>
    %53 = arith.mulf %51, %52 : vector<4x8x8xf32>
    %c0_14 = arith.constant 0 : index
    %c0_15 = arith.constant 0 : index
    %c0_16 = arith.constant 0 : index
    %54 = vector.load %arg2[%c0_14, %c0_15, %c0_16] : memref<1x8x8xf32, #tpu.memory_space<vmem>>, vector<1x8x8xf32>
    %55 = vector.shape_cast %54 : vector<1x8x8xf32> to vector<8x8xf32>
    %56 = vector.shape_cast %55 : vector<8x8xf32> to vector<1x8x8xf32>
    %57 = vector.broadcast %56 : vector<1x8x8xf32> to vector<4x8x8xf32>
    %58 = arith.addf %53, %57 : vector<4x8x8xf32>
    %cst_17 = arith.constant dense<0xFF800000> : vector<4x8xf32>
    %59 = vector.multi_reduction <maximumf>, %58, %cst_17 [2] : vector<4x8x8xf32> to vector<4x8xf32>
    %60 = vector.shape_cast %59 : vector<4x8xf32> to vector<4x8x1xf32>
    %61 = vector.broadcast %60 : vector<4x8x1xf32> to vector<4x8x8xf32>
    %62 = arith.subf %58, %61 : vector<4x8x8xf32>
    %63 = math.exp %62 : vector<4x8x8xf32>
    %cst_18 = arith.constant dense<0.000000e+00> : vector<4x8xf32>
    %64 = vector.multi_reduction <add>, %63, %cst_18 [2] : vector<4x8x8xf32> to vector<4x8xf32>
    %65 = vector.shape_cast %64 : vector<4x8xf32> to vector<4x8x1xf32>
    %66 = vector.broadcast %65 : vector<4x8x1xf32> to vector<4x8x8xf32>
    %67 = arith.divf %63, %66 : vector<4x8x8xf32>
    "tpu.trace_start"() <{level = 10 : i32, message = "hqk,hkd->hqd"}> : () -> ()
    %cst_19 = arith.constant dense<0.000000e+00> : vector<4x8x8xf32>
    %68 = tpu.matmul %67, %50, %cst_19 {dimension_numbers = #tpu.dot_dimension_numbers<[2], [1], [1], [2], [0, 0, 0, 1, 1, 2], [0], [0]>} : vector<4x8x8xf32>, vector<4x8x8xf32>, vector<4x8x8xf32> -> vector<4x8x8xf32>
    "tpu.trace_stop"() : () -> ()
    %69 = vector.extract_strided_slice %68 {offsets = [0, 0, 0], sizes = [1, 8, 8], strides = [1, 1, 1]} : vector<4x8x8xf32> to vector<1x8x8xf32>
    %70 = vector.shape_cast %69 : vector<1x8x8xf32> to vector<8x8xf32>
    %71 = vector.extract_strided_slice %68 {offsets = [1, 0, 0], sizes = [1, 8, 8], strides = [1, 1, 1]} : vector<4x8x8xf32> to vector<1x8x8xf32>
    %72 = vector.shape_cast %71 : vector<1x8x8xf32> to vector<8x8xf32>
    %73 = vector.extract_strided_slice %68 {offsets = [2, 0, 0], sizes = [1, 8, 8], strides = [1, 1, 1]} : vector<4x8x8xf32> to vector<1x8x8xf32>
    %74 = vector.shape_cast %73 : vector<1x8x8xf32> to vector<8x8xf32>
    %75 = vector.extract_strided_slice %68 {offsets = [3, 0, 0], sizes = [1, 8, 8], strides = [1, 1, 1]} : vector<4x8x8xf32> to vector<1x8x8xf32>
    %76 = vector.shape_cast %75 : vector<1x8x8xf32> to vector<8x8xf32>
    %77 = tpu.concatenate %70, %72, %74, %76 in 1 : vector<8x8xf32>, vector<8x8xf32>, vector<8x8xf32>, vector<8x8xf32> -> vector<8x32xf32>
    %c0_20 = arith.constant 0 : index
    %c0_21 = arith.constant 0 : index
    %78 = vector.load %arg6[%c0_20, %c0_21] : memref<32x32xf32, #tpu.memory_space<vmem>>, vector<32x32xf32>
    %cst_22 = arith.constant dense<0.000000e+00> : vector<8x32xf32>
    %79 = tpu.matmul %77, %78, %cst_22 {dimension_numbers = #tpu.dot_dimension_numbers<[1], [0], [0], [1], [0, 0, 1, 1], [], []>} : vector<8x32xf32>, vector<32x32xf32>, vector<8x32xf32> -> vector<8x32xf32>
    %80 = arith.addf %1, %79 : vector<8x32xf32>
    %c1 = arith.constant 1 : index
    %c0_23 = arith.constant 0 : index
    %81 = vector.load %arg4[%c1, %c0_23] : memref<2x32xf32, #tpu.memory_space<vmem>>, vector<1x32xf32>
    %82 = arith.mulf %80, %80 : vector<8x32xf32>
    %cst_24 = arith.constant dense<0.000000e+00> : vector<8xf32>
    %83 = vector.multi_reduction <add>, %82, %cst_24 [1] : vector<8x32xf32> to vector<8xf32>
    %84 = vector.shape_cast %83 : vector<8xf32> to vector<8x1xf32>
    %cst_25 = arith.constant 3.200000e+01 : f32
    %85 = vector.broadcast %cst_25 : f32 to vector<8x1xf32>
    %86 = arith.divf %84, %85 : vector<8x1xf32>
    %cst_26 = arith.constant 9.99999997E-7 : f32
    %87 = vector.broadcast %cst_26 : f32 to vector<8x1xf32>
    %88 = arith.addf %86, %87 : vector<8x1xf32>
    %89 = math.rsqrt %88 : vector<8x1xf32>
    %90 = vector.broadcast %89 : vector<8x1xf32> to vector<8x32xf32>
    %91 = arith.mulf %80, %90 : vector<8x32xf32>
    %92 = vector.broadcast %81 : vector<1x32xf32> to vector<8x32xf32>
    %93 = arith.mulf %92, %91 : vector<8x32xf32>
    %c0_27 = arith.constant 0 : index
    %c0_28 = arith.constant 0 : index
    %94 = vector.load %arg7[%c0_27, %c0_28] : memref<32x128xf32, #tpu.memory_space<vmem>>, vector<32x128xf32>
    %cst_29 = arith.constant dense<0.000000e+00> : vector<8x128xf32>
    %95 = tpu.matmul %93, %94, %cst_29 {dimension_numbers = #tpu.dot_dimension_numbers<[1], [0], [0], [1], [0, 0, 1, 1], [], []>} : vector<8x32xf32>, vector<32x128xf32>, vector<8x128xf32> -> vector<8x128xf32>
    %96 = vector.extract_strided_slice %95 {offsets = [0, 0], sizes = [8, 64], strides = [1, 1]} : vector<8x128xf32> to vector<8x64xf32>
    %97 = vector.extract_strided_slice %95 {offsets = [0, 64], sizes = [8, 64], strides = [1, 1]} : vector<8x128xf32> to vector<8x64xf32>
    %cst_30 = arith.constant 0.000000e+00 : f32
    %98 = vector.broadcast %cst_30 : f32 to vector<8x64xf32>
    %99 = arith.subf %98, %96 : vector<8x64xf32>
    %100 = math.exp %99 : vector<8x64xf32>
    %cst_31 = arith.constant 1.000000e+00 : f32
    %101 = vector.broadcast %cst_31 : f32 to vector<8x64xf32>
    %102 = arith.addf %101, %100 : vector<8x64xf32>
    %cst_32 = arith.constant 1.000000e+00 : f32
    %103 = vector.broadcast %cst_32 : f32 to vector<8x64xf32>
    %104 = arith.divf %103, %102 : vector<8x64xf32>
    %105 = arith.mulf %96, %104 : vector<8x64xf32>
    %106 = arith.mulf %105, %97 : vector<8x64xf32>
    %c0_33 = arith.constant 0 : index
    %c0_34 = arith.constant 0 : index
    %107 = vector.load %arg8[%c0_33, %c0_34] : memref<64x32xf32, #tpu.memory_space<vmem>>, vector<64x32xf32>
    %cst_35 = arith.constant dense<0.000000e+00> : vector<8x32xf32>
    %108 = tpu.matmul %106, %107, %cst_35 {dimension_numbers = #tpu.dot_dimension_numbers<[1], [0], [0], [1], [0, 0, 1, 1], [], []>} : vector<8x64xf32>, vector<64x32xf32>, vector<8x32xf32> -> vector<8x32xf32>
    %109 = arith.addf %80, %108 : vector<8x32xf32>
    %c0_36 = arith.constant 0 : index
    %c0_37 = arith.constant 0 : index
    %c0_38 = arith.constant 0 : index
    %110 = vector.load %arg9[%c0_36, %c0_37, %c0_38] : memref<1x8x32xf32, #tpu.memory_space<vmem>>, vector<1x8x32xf32>
    %111 = vector.shape_cast %110 : vector<1x8x32xf32> to vector<8x32xf32>
    %112 = vector.shape_cast %109 : vector<8x32xf32> to vector<1x8x32xf32>
    tpu.vector_store %arg9[%c0_36, %c0_37, %c0_38], %112 {strides = array<i32>} : memref<1x8x32xf32, #tpu.memory_space<vmem>>, vector<1x8x32xf32>,
    return
  }
  func.func @transform_0(%arg0: i32) -> (i32, i32, i32) {
    %c0_i32 = arith.constant 0 : i32
    %c0_i32_0 = arith.constant 0 : i32
    %c0_i32_1 = arith.constant 0 : i32
    return %arg0, %c0_i32, %c0_i32_0 : i32, i32, i32
  }
  func.func @transform_1(%arg0: i32) -> (i32, i32, i32) {
    %c0_i32 = arith.constant 0 : i32
    %c0_i32_0 = arith.constant 0 : i32
    %c0_i32_1 = arith.constant 0 : i32
    return %arg0, %c0_i32, %c0_i32_0 : i32, i32, i32
  }
  func.func @transform_2(%arg0: i32) -> (i32, i32) {
    %c0_i32 = arith.constant 0 : i32
    %c0_i32_0 = arith.constant 0 : i32
    %c0_i32_1 = arith.constant 0 : i32
    return %c0_i32, %c0_i32_0 : i32, i32
  }
  func.func @transform_3(%arg0: i32) -> (i32, i32) {
    %c0_i32 = arith.constant 0 : i32
    %c0_i32_0 = arith.constant 0 : i32
    %c0_i32_1 = arith.constant 0 : i32
    return %c0_i32, %c0_i32_0 : i32, i32
  }
  func.func @transform_4(%arg0: i32) -> (i32, i32) {
    %c0_i32 = arith.constant 0 : i32
    %c0_i32_0 = arith.constant 0 : i32
    %c0_i32_1 = arith.constant 0 : i32
    return %c0_i32, %c0_i32_0 : i32, i32
  }
  func.func @transform_5(%arg0: i32) -> (i32, i32) {
    %c0_i32 = arith.constant 0 : i32
    %c0_i32_0 = arith.constant 0 : i32
    %c0_i32_1 = arith.constant 0 : i32
    return %c0_i32, %c0_i32_0 : i32, i32
  }
  func.func @transform_6(%arg0: i32) -> (i32, i32) {
    %c0_i32 = arith.constant 0 : i32
    %c0_i32_0 = arith.constant 0 : i32
    %c0_i32_1 = arith.constant 0 : i32
    return %c0_i32, %c0_i32_0 : i32, i32
  }
  func.func @transform_7(%arg0: i32) -> (i32, i32) {
    %c0_i32 = arith.constant 0 : i32
    %c0_i32_0 = arith.constant 0 : i32
    %c0_i32_1 = arith.constant 0 : i32
    return %c0_i32, %c0_i32_0 : i32, i32
  }
  func.func @transform_8(%arg0: i32) -> (i32, i32, i32) {
    %c0_i32 = arith.constant 0 : i32
    %c0_i32_0 = arith.constant 0 : i32
    %c0_i32_1 = arith.constant 0 : i32
    return %arg0, %c0_i32, %c0_i32_0 : i32, i32, i32
  }
}

</mosaic_0001>

<bundles_post_ra>
// kernel: tpu_custom_call.1
= control target key start
LH: loop header
LB: loop body
LE: loop exit
PB: predicated region body
PF: predicated region fallthrough
CT: control target
= control target key end

     0   :  { %s1743_s0 = inlined_call_operand.hbm [shape: f32[2,8,32], index: 0, kind: input, shape index: {}]   ;;  %s1744_s1 = inlined_call_operand.hbm [shape: f32[2,8,8], index: 1, kind: input, shape index: {}]   ;;  %s1745_s2 = inlined_call_operand.hbm [shape: f32[8,128], index: 2, kind: input, shape index: {}]   ;;  %s1746_s3 = inlined_call_operand.hbm [shape: f32[2,32], index: 3, kind: input, shape index: {}]   ;;  %s1747_s4 = inlined_call_operand.vmem [shape: f32[32,128], index: 4, kind: input, shape index: {}]   ;;  %s1748_s5 = inlined_call_operand.vmem [shape: f32[32,32], index: 5, kind: input, shape index: {}]   ;;  %s1749_s6 = inlined_call_operand.vmem [shape: f32[32,128], index: 6, kind: input, shape index: {}]   ;;  %s1750_s7 = inlined_call_operand.vmem [shape: f32[64,32], index: 7, kind: input, shape index: {}]   ;;  %s1751_s8 = inlined_call_operand.hbm [shape: f32[2,8,32], index: 8, kind: output, shape index: {}]  }
   0x1   :  { %1757 = sst [smem:[#allocation21_spill]] %s1745_s2 }
   0x2   :  { %1758 = sst [smem:[#allocation22_spill]] %s1746_s3 }
   0x3   :  { %13 = vsyncpa [#allocation3], 0 }
   0x4   :  { %15 = vsyncpa [#allocation3 + $0x1], 0 }
   0x5   :  { %16 = vsyncpa [#allocation6], 0 }
   0x6   :  { %18 = vsyncpa [#allocation6 + $0x1], 0 }
   0x7   :  { %19 = vsyncpa [#allocation9], 0 }
   0x8   :  { %20 = vsyncpa [#allocation4], 0 }
   0x9   :  { %22 = vsyncpa [#allocation4 + $0x1], 0  ;;  %s1447_s27 = smov 0   ;;  %s1449_s28 = smov 0  }
   0xa   :  { %s1451_s29 = smov 0   ;;  %s1453_s30 = smov 0  }
   0xb LB: > { %1759 = sst [smem:[#allocation16_spill]] %s1384_s29  ;;  %s1468_s9 = sadd.s32 4294967295, %s1388_s30   ;;  %s1388_s30 = sphi %s1453_s30, %s1774_s30   ;;  %s1384_s29 = sphi %s1451_s29, %s1779_s29   ;;  %s1380_s28 = sphi %s1449_s28, %s1778_s28   ;;  %s1376_s27 = sphi %s1447_s27, %s1777_s27  }
   0xc   : > { %1760 = sst [smem:[#allocation17_spill]] %s1388_s30  ;;  %s1040_s10 = sadd.s32 4294967294, %s1388_s30  }
   0xd   : > { %p48_p0 = scmp.ne.s32.totalorder %s1380_s28, %s1376_s27  ;;  %p49_p1 = scmp.eq.s32.totalorder %s1468_s9, 0 }
   0xe   : > { %p224_p2 = scmp.eq.s32.totalorder %s1468_s9, 1  ;;  %p230_p3 = scmp.eq.s32.totalorder %s1040_s10, 1 }
   0xf   : > { %p1477_p4 = por %p49_p1, %p48_p0  ;;  %p1041_p5 = scmp.ge.s32.totalorder %s1388_s30, 1 }
  0x10   : > { %p1482_p6 = por %p230_p3, %p48_p0  ;;  %p237_p7 = scmp.lt.s32.totalorder %s1388_s30, 3 }
  0x11   : > { %s1764_s2 = sld [smem:[#allocation21_spill]]  ;;  %s1390_s17 = smov [#allocation7]  }
  0x12   : > { %s1762_s12 = scalar_select %p1482_p6, 1, 0 }
  0x13   : > { %p1490_p8 = pnand %p1041_p5, %p237_p7  ;;  %s251_s18 = sshll.u32 %s1390_s17, 4  ;;  %s252_s18 = int_to_ptr.vmem [resolvable:$true] %s251_s18 }
  0x14   : > { %1763 = sst [smem:[#allocation18_spill]] %s1762_s12  ;;  %s1391_s22 = smov [#allocation8]  }
  0x15   : > { %p1089_p10 = pneg %p1490_p8  ;;  %s1766_s3 = sld [smem:[#allocation22_spill]] }
  0x16   : > { %s263_s23 = sshll.u32 %s1391_s22, 4  ;;  %s1503_s24 = sadd.s32 1, %s1388_s30   ;;  %s264_s23 = int_to_ptr.vmem [resolvable:$true] %s263_s23 }
  0x17   : > { %s249_s15 = sshll.u32 %s1764_s2, 4  ;;  %p1090_p11 = pnand %p1089_p10, %p49_p1  ;;  %s250_s15 = int_to_ptr.hbm [resolvable:$true] %s249_s15 }
  0x18   : > { %1767 = sst [smem:[#allocation19_spill]] %s1503_s24  ;;  %s35_s25 = sadd.s32 1, %s1384_s29 }
  0x19   : > { %1092 = dma.hbm_to_vmem [thread:$0]  (!%p1090_p11), %s250_s15, 128, %s252_s18, [#allocation6]  }
  0x1a   : > { %s32_s26 = ssub.s32 %s1388_s30, %s1503_s24  ;;  %p42_p12 = scmp.ne.s32.totalorder %s1384_s29, %s1380_s28 }
  0x1b   : > { %s261_s21 = sshll.u32 %s1766_s3, 4  ;;  %p33_p13 = scmp.eq.s32.totalorder %s32_s26, 0  ;;  %s262_s21 = int_to_ptr.hbm [resolvable:$true] %s261_s21 }
  0x1c   : > { %1095 = dma.hbm_to_vmem [thread:$0]  (!%p1090_p11), %s262_s21, 32, %s264_s23, [#allocation9]  }
  0x1d   : > { %p43_p0 = scmp.eq.s32.totalorder %s1388_s30, 0  ;;  %p1513_p3 = por %p224_p2, %p42_p12 }
  0x1e   : > { %p1109_p5 = scmp.lt.s32.totalorder %s1388_s30, 2  ;;  %s286_s14 = sand.u32 1, %s1384_s29  }
  0x1f   : > { %s1519_s13 = scalar_select %p33_p13, %s1384_s29, %s35_s25  }
  0x20   : > { %p44_p7 = por %p43_p0, %p42_p12  ;;  %s1522_s15 = sshll.u32 %s286_s14, 3 }
  0x21   : > { %1769 = sst [smem:[#allocation20_spill]] %s1519_s13  ;;  %s1046_s17 = sshll.u32 %s1388_s30, 3 }
  0x22   : > { %s294_s20 = scalar_lea.hbm %s1743_s0, %s1046_s17  ;;  %s290_s21 = scalar_lea.vmem [#allocation2], %s1522_s15 }
  0x23   : > { %s298_s22 = sshll.u32 %s290_s21, 4  ;;  %s296_s23 = sshll.u32 %s294_s20, 4  ;;  %s299_s22 = int_to_ptr.vmem [resolvable:$true] %s298_s22  ;;  %s297_s23 = int_to_ptr.hbm [resolvable:$true] %s296_s23 }
  0x24   : > { %p1529_p2 = pnand %p1109_p5, %p44_p7  ;;  %s313_s3 = scalar_lea.hbm %s1744_s1, %s1046_s17 }
  0x25   : > { %s305_s13 = sand.u32 1, %s1388_s30   ;;  %s287_s29 = scalar_lea.sflag [#allocation3], %s286_s14 }
  0x26   : > { %s1250_s24 = sshra.s32 %s297_s23, 4  ;;  %p1254_p11 = pneg %p1529_p2  ;;  %s1251_s24 = int_to_ptr.hbm [resolvable:$true] %s1250_s24 }
  0x27   : > { %s1252_s18 = scalar_lea.hbm %s1251_s24, 8  ;;  %s1257_s21 = scalar_lea.hbm %s1743_s0, 16 }
  0x28   : > { %p1253_p10 = scmp.ne.s32.totalorder %s1251_s24, %s1252_s18  ;;  %p1258_p0 = scmp.lt.s32.totalorder %s1251_s24, %s1743_s0 }
  0x29   : > { %p1259_p5 = scmp.lt.s32.totalorder %s1257_s21, %s1252_s18 }
  0x2a   : > { %p1255_p12 = pnand %p1254_p11, %p1253_p10 }
  0x2b   : > { %p1260_p7 = por %p1259_p5, %p1258_p0 }
  0x2c   : > { %p1256_p13 = pneg %p1255_p12 }
  0x2e   : > { %p1261_p9 = pnand %p1260_p7, %p1256_p13 }
  0x30   : > { %1264 = shalt.err (!%p1261_p9)
}
  0x31   : > { %1099 = dma.hbm_to_vmem [thread:$0]  (!%p1529_p2), %s297_s23, 128, %s299_s22, %s287_s29  }
  0x32   : > { %s315_s14 = sshll.u32 %s313_s3, 4  ;;  %s309_s17 = scalar_lea.vmem [#allocation5], %s1522_s15  ;;  %s316_s14 = int_to_ptr.hbm [resolvable:$true] %s315_s14 }
  0x33   : > { %s317_s30 = sshll.u32 %s309_s17, 4  ;;  %s306_s19 = scalar_lea.sflag [#allocation6], %s305_s13  ;;  %s318_s30 = int_to_ptr.vmem [resolvable:$true] %s317_s30 }
  0x34   : > { %s1280_s20 = sshra.s32 %s316_s14, 4  ;;  %s1287_s21 = scalar_lea.hbm %s1744_s1, 16  ;;  %s1281_s20 = int_to_ptr.hbm [resolvable:$true] %s1280_s20 }
  0x35   : > { %s1282_s12 = scalar_lea.hbm %s1281_s20, 8  ;;  %p1288_p9 = scmp.lt.s32.totalorder %s1281_s20, %s1744_s1 }
  0x36   : > { %p1283_p10 = scmp.ne.s32.totalorder %s1281_s20, %s1282_s12  ;;  %p1289_p0 = scmp.lt.s32.totalorder %s1287_s21, %s1282_s12 }
  0x38   : > { %p1285_p12 = pnand %p1283_p10, %p1254_p11  ;;  %p1290_p5 = por %p1289_p0, %p1288_p9 }
  0x3a   : > { %p1286_p13 = pneg %p1285_p12 }
  0x3c   : > { %p1291_p7 = pnand %p1290_p5, %p1286_p13 }
  0x3e   : > { %1294 = shalt.err (!%p1291_p7)
}
  0x3f   : > { %1102 = dma.hbm_to_vmem [thread:$0]  (!%p1529_p2), %s316_s14, 128, %s318_s30, %s306_s19  }
  0x40   : > { %326 = sbr.rel (%p1490_p8) target bundleno = 1960 (0x7a8), region = 52  ;;  %s1565_s3 = sand.u32 (!%p1490_p8), 1, %s1380_s28  }
  0x41   : > { %s1568_s13 = sshll.u32 (!%p1490_p8), %s1565_s3, 3  ;;  %s329_s15 = scalar_lea.sflag (!%p1490_p8), [#allocation3], %s1565_s3 }
  0x42   : > { %s332_s12 = scalar_lea.vmem (!%p1490_p8), [#allocation2], %s1568_s13 }
  0x45   : > { %1355 = dma.done.wait (%p1477_p4), %s329_s15, 128  }
  0x46   : > { %1357 = vsyncadd (%p1477_p4), %s329_s15, 4294967168  ;;  %s338_s30 = sand.u32 1, %s1468_s9   ;;  %s342_s22 = scalar_lea.vmem [#allocation5], %s1568_s13 }
  0x47   : > { %s339_s16 = scalar_lea.sflag [#allocation6], %s338_s30 }
  0x48   : > { %1359 = dma.done.wait (%p1477_p4), %s339_s16, 128  }
  0x49   : > { %1361 = vsyncadd (%p1477_p4), %s339_s16, 4294967168 }
  0x4a   : > { %1363 = dma.done.wait (%p49_p1), [#allocation6], 128  }
  0x4b   : > { %1365 = vsyncadd (%p49_p1), [#allocation6], 4294967168 }
  0x4c   : > { %1367 = dma.done.wait (%p49_p1), [#allocation9], 32  }
  0x4d   : > { %1369 = vsyncadd (%p49_p1), [#allocation9], 4294967264  ;;  %v1590_v0 = vld [vmem:[%s332_s12] sm:$0xff]  ;;  %vm394_vm0 = vcmask 261120   ;;  %v1392_v3 = vmov 32.0   ;;  %v423_v7 = vld [vmem:[%s1747_s4 + $0x18] sm:$0xff] }
  0x4e   : > { %v393_v1 = vmul.f32 %v1590_v0, %v1590_v0  ;;  %1164 = vrcp.f32 %v1392_v3  ;;  %439 = vmatpush.msra.mxu0 %v423_v7  ;;  %v422_v8 = vld [vmem:[%s1747_s4 + $0x10] sm:$0xff]  ;;  %v421_v9 = vld [vmem:[%s1747_s4 + $0x8] sm:$0xff]  ;;  %v420_v11 = vld [vmem:[%s1747_s4] sm:$0xff]  ;;  %s1393_s24 = smov 64   ;;  %s1394_s18 = smov 120   ;;  %vm463_vm5 = vcmask 64512  }
  0x4f   : > { %v1162_v23 = vld [vmem:[#allocation8] ss:$0 sm:$0xff]  ;;  %v447_v27 = vld [vmem:[#allocation7] sm:$0xff]  ;;  %s1395_s21 = smov 96   ;;  %s1396_s2 = smov 104   ;;  %v562_v40 = vld [vmem:[%s342_s22] sm:$0xff] }
  0x50   : > { %v395_v2 = vsel %vm394_vm0, %v393_v1, 0.0  ;;  %440 = vmatpush.msra.mxu0 %v422_v8  ;;  %s1397_s29 = smov 112   ;;  %s1398_s15 = smov 80  }
  0x51   : > { %396 = vadd.xlane.f32.xlu0 %v395_v2  ;;  %s1399_s12 = smov 8   ;;  %s1400_s30 = smov 16  }
  0x52   : > { %441 = vmatpush.msra.mxu0 %v421_v9  ;;  %s1401_s16 = smov 24   ;;  %s390_s11 = scalar_lea.vmem [#allocation10], %s1568_s13 }
  0x53   : > { %s925_s23 = sshll.u32 %s390_s11, 4  ;;  %s913_s25 = scalar_lea.sflag [#allocation4], %s1565_s3  ;;  %s926_s23 = int_to_ptr.vmem [resolvable:$true] %s925_s23 }
  0x54   : > { %v1165_v4 = vpop.eup %1164  ;;  %442 = vmatpush.msra.mxu0 %v420_v11  ;;  %s1330_s13 = scalar_lea.hbm %s1751_s8, 16 }
  0x55   : > { %v399_v5 = vmul.f32 32.0, %v1165_v4  ;;  %vm403_vm1 = vweird.f32 %v1165_v4 }
  0x57   : > { %v400_v6 = vsub.f32 1.0, %v399_v5 }
  0x59   : > { %v401_v10 = vmul.f32 %v1165_v4, %v400_v6 }
  0x5b   : > { %v402_v12 = vadd.f32 %v1165_v4, %v401_v10 }
  0x5d   : > { %v1607_v13 = vsel %vm403_vm1, %v1165_v4, %v402_v12 }
  0xc4   : > { %v397_v14 = vpop.xlane.xlu0 %396 }
  0xc5   : > { %v405_v15 = vmul.f32 %v1607_v13, %v397_v14 }
  0xc7   : > { %v406_v16 = vadd.f32 1e-06, %v405_v15 }
  0xc9   : > { %1166 = vrsqrt.f32 %v406_v16  ;;  %vm413_vm3 = vweird.f32 %v406_v16 }
  0xcf   : > { %v1167_v17 = vpop.eup %1166 }
  0xd0   : > { %v408_v18 = vmul.f32 %v1167_v17, %v406_v16  ;;  %vm414_vm2 = vweird.f32 %v1167_v17 }
  0xd1   : > { %vm415_vm4 = vmor %vm413_vm3, %vm414_vm2 }
  0xd2   : > { %v409_v19 = vmul.f32 %v1167_v17, %v408_v18 }
  0xd4   : > { %v410_v20 = vmul.f32 0.5, %v409_v19 }
  0xd6   : > { %v411_v21 = vsub.f32 1.5, %v410_v20 }
  0xd8   : > { %v412_v22 = vmul.f32 %v1167_v17, %v411_v21 }
  0xda   : > { %v416_v24 = vsel %vm415_vm4, %v1167_v17, %v412_v22 }
  0xdb   : > { %v417_v25 = vmul.f32 %v416_v24, %v1590_v0 }
  0xdd   : > { %v419_v26 = vmul.f32 %v1162_v23, %v417_v25 }
  0xdf   : > { %1055 = vmatmul.msk.f32.vlgmr.msra.gmra.mxu0 %vm394_vm0, %v419_v26 }
 0x15c   : > { %v444_v28 = vpop.f32.mrf.mxu0 }
 0x15d   : > { %v448_v29 = vmul.f32 %v447_v27, %v444_v28 }
 0x15f   : > { %450 = vrot.lane.b32.xlu0 %v448_v29, %s1393_s24 }
 0x1d1   : > { %v451_v30 = vpop.permute.xlu0 %450 }
 0x1d2   : > { %v453_v31 = vadd.f32 %v451_v30, %v448_v29 }
 0x1d4   : > { %455 = vrot.lane.b32.xlu1 %v453_v31, %s1394_s18 }
 0x1dc   : > { %461 = vrot.lane.b32.xlu1 %v453_v31, %s1395_s21 }
 0x1e4   : > { %459 = vrot.lane.b32.xlu1 %v453_v31, %s1396_s2 }
 0x246   : > { %v456_v32 = vpop.permute.xlu1 %455 }
 0x247   : > { %510 = vrot.lane.b32.xlu2 %v456_v32, %s1395_s21  ;;  %v1157_v59 = vpack.i.bf16 %v456_v32, %v453_v31 }
 0x24e   : > { %v462_v33 = vpop.permute.xlu1 %461 }
 0x24f   : > { %457 = vrot.lane.b32.xlu2 %v453_v31, %s1397_s29  ;;  %1056 = vmatpush.xpose.msk.msra.mxu1 %vm463_vm5, %v462_v33 }
 0x250   : > { %1058 = vmatpush.xpose.msk.msra.mxu2 %vm463_vm5, %v462_v33 }
 0x252   : > { %1057 = vmatmul.msk.f32.vlgmr.msra.gmra.mxu1 %vm463_vm5, %v453_v31 }
 0x253   : > { %1059 = vmatmul.msk.f32.vlgmr.msra.gmra.mxu2 %vm463_vm5, %v456_v32 }
 0x256   : > { %v460_v35 = vpop.permute.xlu1 %459 }
 0x2a1   : > { %v511_v34 = vpop.permute.xlu2 %510 }
 0x2a2   : > { %1060 = vmatpush.xpose.msk.msra.mxu3 %vm463_vm5, %v511_v34  ;;  %1062 = vmatpush.xpose.msk.msrb.mxu1 %vm463_vm5, %v511_v34 }
 0x2a5   : > { %1063 = vmatmul.msk.f32.vlgmr.msrb.gmra.mxu1 %vm463_vm5, %v460_v35 }
 0x2a9   : > { %v458_v36 = vpop.permute.xlu2 %457 }
 0x2aa   : > { %1061 = vmatmul.msk.f32.vlgmr.msra.gmra.mxu3 %vm463_vm5, %v458_v36 }
 0x2cf   : > { %v485_v39 = vpop.f32.mrf.mxu1 }
 0x2d0   : > { %v558_v42 = vmul.f32 0.35355338, %v485_v39 }
 0x2d2   : > { %v563_v44 = vadd.f32 %v562_v40, %v558_v42 }
 0x2d4   : > { %v567_v45 = vsel %vm463_vm5, %v563_v44, -inf }
 0x2d6   : > { %v507_v37 = vpop.f32.mrf.mxu2 }
 0x2d7   : > { %v559_v38 = vmul.f32 0.35355338, %v507_v37 }
 0x2d9   : > { %v564_v41 = vadd.f32 %v562_v40, %v559_v38 }
 0x2db   : > { %v570_v43 = vsel %vm463_vm5, %v564_v41, -inf }
 0x2dc   : > { %571 = vmax.xlane.f32.xlu2 %v570_v43 }
 0x2e4   : > { %568 = vmax.xlane.f32.xlu2 %v567_v45 }
 0x322   : > { %v555_v46 = vpop.f32.mrf.mxu1 }
 0x323   : > { %v561_v47 = vmul.f32 0.35355338, %v555_v46 }
 0x325   : > { %v566_v48 = vadd.f32 %v562_v40, %v561_v47 }
 0x327   : > { %v576_v49 = vsel %vm463_vm5, %v566_v48, -inf }
 0x328   : > { %577 = vmax.xlane.f32.xlu0 %v576_v49 }
 0x32d   : > { %v533_v50 = vpop.f32.mrf.mxu3 }
 0x32e   : > { %v560_v51 = vmul.f32 0.35355338, %v533_v50 }
 0x330   : > { %v565_v52 = vadd.f32 %v562_v40, %v560_v51 }
 0x332   : > { %v573_v53 = vsel %vm463_vm5, %v565_v52, -inf }
 0x333   : > { %574 = vmax.xlane.f32.xlu1 %v573_v53 }
 0x34f   : > { %v572_v54 = vpop.xlane.xlu2 %571 }
 0x350   : > { %v580_v55 = vsub.f32 %v564_v41, %v572_v54 }
 0x352   : > { %v585_v56 = vmul.f32 1.442695, %v580_v55 }
 0x354   : > { %1168 = vpow2.f32 %v585_v56 }
 0x357   : > { %v569_v1 = vpop.xlane.xlu2 %568 }
 0x358   : > { %v579_v5 = vsub.f32 %v563_v44, %v569_v1 }
 0x35a   : > { %v1169_v57 = vpop.eup %1168  ;;  %v583_v7 = vmul.f32 1.442695, %v579_v5  ;;  %v781_v5 = vld [vmem:[%s1748_s5 + $0x18] sm:$0xff] }
 0x35b   : > { %v594_v58 = vsel %vm463_vm5, %v1169_v57, 0.0 }
 0x35c   : > { %595 = vadd.xlane.f32.xlu2 %v594_v58 }
 0x374   : > { %1158 = vrot.lane.b32.xlu2 %v1157_v59, %s1398_s15 }
 0x39b   : > { %v578_v60 = vpop.xlane.xlu0 %577 }
 0x39c   : > { %v582_v61 = vsub.f32 %v566_v48, %v578_v60 }
 0x39e   : > { %v589_v62 = vmul.f32 1.442695, %v582_v61 }
 0x3a0   : > { %1170 = vpow2.f32 %v589_v62 }
 0x3a6   : > { %v1628_v63 = vpop.eup %1170  ;;  %v575_v2 = vpop.xlane.xlu1 %574 }
 0x3a7   : > { %v581_v3 = vsub.f32 %v565_v52, %v575_v2  ;;  %v600_v4 = vsel %vm463_vm5, %v1628_v63, 0.0 }
 0x3a8   : > { %601 = vadd.xlane.f32.xlu0 %v600_v4 }
 0x3a9   : > { %v587_v6 = vmul.f32 1.442695, %v581_v3 }
 0x3ab   : > { %1172 = vpow2.f32 %v587_v6  ;;  %v779_v6 = vld [vmem:[%s1748_s5 + $0x8] sm:$0xff] }
 0x3ac   : > { %1174 = vpow2.f32 %v583_v7  ;;  %v778_v7 = vld [vmem:[%s1748_s5] sm:$0xff] }
 0x3b1   : > { %v1632_v8 = vpop.eup %1172 }
 0x3b2   : > { %v597_v9 = vsel %vm463_vm5, %v1632_v8, 0.0  ;;  %v1636_v10 = vpop.eup %1174 }
 0x3b3   : > { %598 = vadd.xlane.f32.xlu1 %v597_v9  ;;  %v591_v11 = vsel %vm463_vm5, %v1636_v10, 0.0 }
 0x3bb   : > { %592 = vadd.xlane.f32.xlu1 %v591_v11 }
 0x3cf   : > { %v596_v12 = vpop.xlane.xlu2 %595 }
 0x3d0   : > { %1176 = vrcp.f32 %v596_v12  ;;  %v629_v20 = vand.u32 2147483648, %v596_v12  ;;  %v627_v22 = vand.u32 2147483647, %v596_v12  ;;  %vm623_vm7 = vweird.f32 %v596_v12 }
 0x3d2   : > { %v630_v24 = vor.u32 1.1754944e-38, %v629_v20  ;;  %vm628_vm9 = vcmp.eq.f32.partialorder %v627_v22, 8.507059e+37  ;;  %v829_v20 = vld [vmem:[%s1749_s6 + $0x18] sm:$0xff]  ;;  %v826_v22 = vld [vmem:[%s1749_s6] sm:$0xff] }
 0x3d6   : > { %v1177_v14 = vpop.eup %1176 }
 0x3d7   : > { %v619_v15 = vmul.f32 %v1177_v14, %v596_v12  ;;  %v1159_v16 = vpop.permute.xlu2 %1158  ;;  %vm624_vm6 = vweird.f32 %v1177_v14 }
 0x3d8   : > { %v1161_v17 = vunpack.i.h.bf16 %v1159_v16  ;;  %v1160_v18 = vunpack.i.l.bf16 %v1159_v16  ;;  %vm625_vm8 = vmor %vm623_vm7, %vm624_vm6 }
 0x3d9   : > { %v620_v19 = vsub.f32 1.0, %v619_v15 }
 0x3da   : > { %684 = vmatpush.msrb.mxu2 %v1160_v18  ;;  %707 = vmatpush.msrb.mxu3 %v1160_v18 }
 0x3db   : > { %v621_v21 = vmul.f32 %v1177_v14, %v620_v19  ;;  %733 = vmatpush.msra.mxu1 %v1161_v17 }
 0x3dc   : > { %797 = vmatpush.msra.mxu2 %v781_v5  ;;  %845 = vmatpush.msra.mxu3 %v829_v20 }
 0x3dd   : > { %756 = vmatpush.msrb.mxu1 %v1161_v17  ;;  %v622_v23 = vadd.f32 %v1177_v14, %v621_v21  ;;  %v828_v21 = vld [vmem:[%s1749_s6 + $0x10] sm:$0xff] }
 0x3de   : > { %846 = vmatpush.msra.mxu3 %v828_v21 }
 0x3df   : > { %v626_v25 = vsel %vm625_vm8, %v1177_v14, %v622_v23  ;;  %vm774_vm8 = vcmask 130048  }
 0x3e0   : > { %v631_v26 = vsel %vm628_vm9, %v630_v24, %v626_v25  ;;  %vm776_vm9 = vcmask 195584  }
 0x3e1   : > { %v632_v27 = vmul.f32 %v1169_v57, %v631_v26 }
 0x3e3   : > { %1065 = vmatmul.msk.f32.vlgmr.msrb.gmra.mxu3 %vm463_vm5, %v632_v27 }
 0x41b   : > { %v602_v28 = vpop.xlane.xlu0 %601 }
 0x41c   : > { %1178 = vrcp.f32 %v602_v28  ;;  %v659_v47 = vand.u32 2147483648, %v602_v28  ;;  %vm653_vm15 = vweird.f32 %v602_v28  ;;  %v657_v49 = vand.u32 2147483647, %v602_v28 }
 0x41e   : > { %v660_v56 = vor.u32 1.1754944e-38, %v659_v47  ;;  %vm658_vm3 = vcmp.eq.f32.partialorder %v657_v49, 8.507059e+37  ;;  %v878_v47 = vld [vmem:[%s1750_s7] sm:$0xff] }
 0x422   : > { %v1179_v30 = vpop.eup %1178 }
 0x423   : > { %v649_v31 = vmul.f32 %v1179_v30, %v602_v28  ;;  %vm654_vm12 = vweird.f32 %v1179_v30 }
 0x424   : > { %vm655_vm1 = vmor %vm653_vm15, %vm654_vm12 }
 0x425   : > { %v650_v33 = vsub.f32 1.0, %v649_v31 }
 0x426   : > { %v599_v29 = vpop.xlane.xlu1 %598 }
 0x427   : > { %1180 = vrcp.f32 %v599_v29  ;;  %v644_v37 = vand.u32 2147483648, %v599_v29  ;;  %v651_v38 = vmul.f32 %v1179_v30, %v650_v33  ;;  %v642_v40 = vand.u32 2147483647, %v599_v29 }
 0x428   : > { %vm638_vm11 = vweird.f32 %v599_v29 }
 0x429   : > { %v645_v43 = vor.u32 1.1754944e-38, %v644_v37  ;;  %v652_v44 = vadd.f32 %v1179_v30, %v651_v38  ;;  %vm643_vm14 = vcmp.eq.f32.partialorder %v642_v40, 8.507059e+37  ;;  %v883_v38 = vld [vmem:[%s1750_s7 + $0x28] sm:$0xff]  ;;  %v881_v40 = vld [vmem:[%s1750_s7 + $0x18] sm:$0xff] }
 0x42b   : > { %v656_v53 = vsel %vm655_vm1, %v1179_v30, %v652_v44  ;;  %vm886_vm1 = vcmask 523264  }
 0x42c   : > { %v661_v58 = vsel %vm658_vm3, %v660_v56, %v656_v53 }
 0x42d   : > { %v1181_v32 = vpop.eup %1180  ;;  %v662_v1 = vmul.f32 %v1628_v63, %v661_v58  ;;  %v780_v63 = vld [vmem:[%s1748_s5 + $0x10] sm:$0xff] }
 0x42e   : > { %v634_v34 = vmul.f32 %v1181_v32, %v599_v29  ;;  %v593_v35 = vpop.xlane.xlu1 %592  ;;  %vm639_vm10 = vweird.f32 %v1181_v32  ;;  %798 = vmatpush.msra.mxu2 %v780_v63 }
 0x42f   : > { %1182 = vrcp.f32 %v593_v35  ;;  %vm640_vm13 = vmor %vm638_vm11, %vm639_vm10  ;;  %v614_v52 = vand.u32 2147483648, %v593_v35  ;;  %v612_v55 = vand.u32 2147483647, %v593_v35  ;;  %vm608_vm4 = vweird.f32 %v593_v35 }
 0x430   : > { %v635_v36 = vsub.f32 1.0, %v634_v34  ;;  %799 = vmatpush.msra.mxu2 %v779_v6 }
 0x431   : > { %v615_v59 = vor.u32 1.1754944e-38, %v614_v52  ;;  %vm613_vm7 = vcmp.eq.f32.partialorder %v612_v55, 8.507059e+37 }
 0x432   : > { %v636_v39 = vmul.f32 %v1181_v32, %v635_v36  ;;  %800 = vmatpush.msra.mxu2 %v778_v7  ;;  %v884_v36 = vld [vmem:[%s1750_s7 + $0x30] sm:$0xff] }
 0x434   : > { %v637_v41 = vadd.f32 %v1181_v32, %v636_v39  ;;  %v882_v39 = vld [vmem:[%s1750_s7 + $0x20] sm:$0xff] }
 0x435   : > { %v1183_v42 = vpop.eup %1182 }
 0x436   : > { %v641_v45 = vsel %vm640_vm13, %v1181_v32, %v637_v41  ;;  %v604_v46 = vmul.f32 %v1183_v42, %v593_v35  ;;  %vm609_vm2 = vweird.f32 %v1183_v42  ;;  %v1163_v32 = vld [vmem:[#allocation8 + $0x1] ss:$0 sm:$0xff]  ;;  %v880_v41 = vld [vmem:[%s1750_s7 + $0x10] sm:$0xff] }
 0x437   : > { %v646_v48 = vsel %vm643_vm14, %v645_v43, %v641_v45  ;;  %vm610_vm6 = vmor %vm608_vm4, %vm609_vm2 }
 0x438   : > { %v605_v50 = vsub.f32 1.0, %v604_v46  ;;  %v647_v51 = vmul.f32 %v1632_v8, %v646_v48 }
 0x43a   : > { %v606_v54 = vmul.f32 %v1183_v42, %v605_v50  ;;  %1066 = vmatmul.msk.f32.vlgmr.msra.gmra.mxu1 %vm463_vm5, %v647_v51 }
 0x43c   : > { %v607_v57 = vadd.f32 %v1183_v42, %v606_v54 }
 0x43e   : > { %v611_v60 = vsel %vm610_vm6, %v1183_v42, %v607_v57  ;;  %v879_v42 = vld [vmem:[%s1750_s7 + $0x8] sm:$0xff] }
 0x43f   : > { %v616_v61 = vsel %vm613_vm7, %v615_v59, %v611_v60 }
 0x440   : > { %v617_v62 = vmul.f32 %v1636_v10, %v616_v61 }
 0x442   : > { %1064 = vmatmul.msk.f32.vlgmr.msrb.gmra.mxu2 %vm463_vm5, %v617_v62  ;;  %1067 = vmatmul.msk.f32.vlgmr.msrb.gmra.mxu1 %vm463_vm5, %v662_v1 }
 0x466   : > { %v709_v2 = vpop.f32.mrf.mxu3 }
 0x467   : > { %762 = vrot.lane.b32.xlu0 %v709_v2, %s1399_s12  ;;  %s1072_s12 = sshll.u32 %s1468_s9, 3 }
 0x468   : > { %s923_s22 = scalar_lea.hbm %s1751_s8, %s1072_s12 }
 0x469   : > { %s927_s26 = sshll.u32 %s923_s22, 4  ;;  %s928_s26 = int_to_ptr.hbm [resolvable:$true] %s927_s26 }
 0x46a   : > { %s1324_s14 = sshra.s32 %s928_s26, 4  ;;  %s1325_s14 = int_to_ptr.hbm [resolvable:$true] %s1324_s14 }
 0x46b   : > { %s1326_s17 = scalar_lea.hbm %s1325_s14, 8  ;;  %p1331_p2 = scmp.lt.s32.totalorder %s1325_s14, %s1751_s8 }
 0x46c   : > { %p1327_p1 = scmp.ne.s32.totalorder %s1325_s14, %s1326_s17  ;;  %p1332_p11 = scmp.lt.s32.totalorder %s1330_s13, %s1326_s17 }
 0x46e   : > { %p1328_p4 = pnand %p1327_p1, %p1513_p3  ;;  %p1333_p10 = por %p1332_p11, %p1331_p2 }
 0x470   : > { %p1329_p8 = pneg %p1328_p4 }
 0x472   : > { %p1334_p12 = pnand %p1333_p10, %p1329_p8 }
 0x4b7   : > { %v735_v3 = vpop.f32.mrf.mxu1 }
 0x4b8   : > { %766 = vrot.lane.b32.xlu1 %v735_v3, %s1400_s30 }
 0x4bf   : > { %v758_v4 = vpop.f32.mrf.mxu1 }
 0x4c0   : > { %770 = vrot.lane.b32.xlu2 %v758_v4, %s1401_s16 }
 0x4c5   : > { %v686_v9 = vpop.f32.mrf.mxu2 }
 0x4d9   : > { %v763_v8 = vpop.permute.xlu0 %762 }
 0x4da   : > { %v773_v10 = vsel %vm463_vm5, %v686_v9, %v763_v8 }
 0x51a   : > { %v771_v12 = vpop.permute.xlu2 %770 }
 0x52a   : > { %v767_v11 = vpop.permute.xlu1 %766 }
 0x52b   : > { %v775_v14 = vsel %vm774_vm8, %v773_v10, %v767_v11 }
 0x52c   : > { %v777_v15 = vsel %vm776_vm9, %v775_v14, %v771_v12 }
 0x52d   : > { %1068 = vmatmul.msk.f32.vlgmr.msra.gmra.mxu2 %vm394_vm0, %v777_v15 }
 0x5b0   : > { %v802_v16 = vpop.f32.mrf.mxu2 }
 0x5b1   : > { %v1662_v17 = vadd.f32 %v802_v16, %v1590_v0  ;;  %v827_v0 = vld [vmem:[%s1749_s6 + $0x8] sm:$0xff] }
 0x5b2   : > { %847 = vmatpush.msra.mxu3 %v827_v0 }
 0x5b3   : > { %v807_v18 = vmul.f32 %v1662_v17, %v1662_v17 }
 0x5b4   : > { %848 = vmatpush.msra.mxu3 %v826_v22 }
 0x5b5   : > { %v808_v19 = vsel %vm394_vm0, %v807_v18, 0.0 }
 0x5b6   : > { %809 = vadd.xlane.f32.xlu0 %v808_v19 }
 0x629   : > { %v810_v23 = vpop.xlane.xlu0 %809 }
 0x62a   : > { %v811_v24 = vmul.f32 %v810_v23, %v1607_v13  ;;  %v885_v13 = vld [vmem:[%s1750_s7 + $0x38] sm:$0xff] }
 0x62b   : > { %898 = vmatpush.msrb.mxu0 %v885_v13 }
 0x62c   : > { %v812_v25 = vadd.f32 1e-06, %v811_v24 }
 0x62d   : > { %899 = vmatpush.msrb.mxu0 %v884_v36 }
 0x62e   : > { %1184 = vrsqrt.f32 %v812_v25  ;;  %vm819_vm10 = vweird.f32 %v812_v25 }
 0x62f   : > { %900 = vmatpush.msrb.mxu0 %v883_v38 }
 0x631   : > { %901 = vmatpush.msrb.mxu0 %v882_v39 }
 0x633   : > { %902 = vmatpush.msrb.mxu0 %v881_v40 }
 0x634   : > { %v1185_v26 = vpop.eup %1184 }
 0x635   : > { %v814_v27 = vmul.f32 %v1185_v26, %v812_v25  ;;  %vm820_vm5 = vweird.f32 %v1185_v26  ;;  %903 = vmatpush.msrb.mxu0 %v880_v41 }
 0x636   : > { %vm821_vm11 = vmor %vm819_vm10, %vm820_vm5 }
 0x637   : > { %v815_v28 = vmul.f32 %v1185_v26, %v814_v27  ;;  %904 = vmatpush.msrb.mxu0 %v879_v42 }
 0x639   : > { %v816_v29 = vmul.f32 0.5, %v815_v28  ;;  %905 = vmatpush.msrb.mxu0 %v878_v47 }
 0x63b   : > { %v817_v30 = vsub.f32 1.5, %v816_v29 }
 0x63d   : > { %v818_v31 = vmul.f32 %v1185_v26, %v817_v30 }
 0x63f   : > { %v822_v33 = vsel %vm821_vm11, %v1185_v26, %v818_v31 }
 0x640   : > { %v823_v34 = vmul.f32 %v822_v33, %v1662_v17 }
 0x642   : > { %v825_v35 = vmul.f32 %v1163_v32, %v823_v34 }
 0x644   : > { %1069 = vmatmul.msk.f32.vlgmr.msra.gmra.mxu3 %vm394_vm0, %v825_v35 }
 0x6c7   : > { %v850_v37 = vpop.f32.mrf.mxu3 }
 0x6c8   : > { %874 = vrot.lane.b32.xlu2 %v850_v37, %s1393_s24  ;;  %v853_v43 = vsub.f32 0.0, %v850_v37 }
 0x6ca   : > { %v854_v44 = vmul.f32 1.442695, %v853_v43 }
 0x6cc   : > { %1186 = vpow2.f32 %v854_v44 }
 0x6d2   : > { %v1187_v45 = vpop.eup %1186 }
 0x6d3   : > { %v856_v46 = vadd.f32 1.0, %v1187_v45 }
 0x6d5   : > { %1188 = vrcp.f32 %v856_v46  ;;  %v868_v53 = vand.u32 2147483648, %v856_v46  ;;  %vm862_vm13 = vweird.f32 %v856_v46  ;;  %v866_v54 = vand.u32 2147483647, %v856_v46 }
 0x6d7   : > { %v869_v56 = vor.u32 1.1754944e-38, %v868_v53  ;;  %vm867_vm15 = vcmp.eq.f32.partialorder %v866_v54, 8.507059e+37 }
 0x6db   : > { %v1189_v48 = vpop.eup %1188 }
 0x6dc   : > { %v858_v49 = vmul.f32 %v1189_v48, %v856_v46  ;;  %vm863_vm12 = vweird.f32 %v1189_v48 }
 0x6dd   : > { %vm864_vm14 = vmor %vm862_vm13, %vm863_vm12 }
 0x6de   : > { %v859_v50 = vsub.f32 1.0, %v858_v49 }
 0x6e0   : > { %v860_v51 = vmul.f32 %v1189_v48, %v859_v50 }
 0x6e2   : > { %v861_v52 = vadd.f32 %v1189_v48, %v860_v51 }
 0x6e4   : > { %v865_v55 = vsel %vm864_vm14, %v1189_v48, %v861_v52 }
 0x6e5   : > { %v870_v57 = vsel %vm867_vm15, %v869_v56, %v865_v55 }
 0x6e6   : > { %v872_v58 = vmul.f32 %v870_v57, %v850_v37 }
 0x722   : > { %v875_v59 = vpop.permute.xlu2 %874 }
 0x723   : > { %v877_v60 = vmul.f32 %v875_v59, %v872_v58 }
 0x725   : > { %1070 = vmatmul.msk.f32.vlgmr.msrb.gmra.mxu0 %vm886_vm1, %v877_v60 }
 0x7a2   : > { %v907_v61 = vpop.f32.mrf.mxu0 }
 0x7a3   : > { %v910_v62 = vadd.f32 %v907_v61, %v1662_v17 }
 0x7a5   : > { %911 = vst.msk [vmem:[%s390_s11] sm:$0xff] %vm394_vm0, %v910_v62 }
 0x7a6   : > { %1337 = shalt.err (!%p1334_p12)
}
 0x7a7   : > { %1087 = dma.vmem_to_hbm [thread:$0]  (%p1513_p3), %s926_s23, 128, %s928_s26, %s913_s25  }
 0x7a8 PF: > { %s1772_s21 = sld [smem:[#allocation17_spill]]  ;;  %s939_s24 = sand.u32 1, %s1376_s27  }
 0x7a9   : > { %s940_s2 = scalar_lea.sflag [#allocation4], %s939_s24 }
 0x7ae   : > { %p1773_p13 = scmp.ge.s32.totalorder %s1772_s21, 2 }
 0x7b0   : > { %p1104_p9 = pnand %p1773_p13, %p1482_p6 }
 0x7b2   : > { %p1105_p0 = pneg %p1104_p9 }
 0x7b4   : > { %1371 = dma.done.wait (%p1105_p0), %s940_s2, 128  }
 0x7b5   : > { %1373 = vsyncadd (%p1105_p0), %s940_s2, 4294967168  ;;  %s1774_s30 = sld [smem:[#allocation19_spill]]  ;;  %s1777_s27 = smov %s1380_s28 }
 0x7b6   : > { %s1775_s29 = sld [smem:[#allocation16_spill]] }
 0x7b7   : > { %s1776_s15 = sld [smem:[#allocation20_spill]] }
 0x7bb   : > { %p25_p5 = scmp.ge.s32.totalorder %s1774_s30, 4  }
 0x7bc   : > { %s1778_s28 = smov %s1775_s29 }
 0x7bd   : > { %s1779_s29 = smov %s1776_s15  ;;  %27 = sbr.rel (!%p25_p5) target bundleno = 11 (0xb), region = 118 }
 0x7c2   :  { %946 = vsyncpa [#allocation3], 1 }
 0x7c3   :  { %948 = vsyncpa [#allocation3 + $0x1], 1 }
 0x7c4   :  { %949 = vsyncpa [#allocation6], 1 }
 0x7c5   :  { %951 = vsyncpa [#allocation6 + $0x1], 1 }
 0x7c6   :  { %952 = vsyncpa [#allocation9], 1 }
 0x7c7   :  { %953 = vsyncpa [#allocation4], 1 }
 0x7c8   :  { %955 = vsyncpa [#allocation4 + $0x1], 1 }

</bundles_post_ra>
